<compile_context>
chip_gen: v7x
topology: tpu7x:2x2x1
jax: 0.10.0
libtpu: 0.0.40
codegen_flags: <defaults>
</compile_context>

<pallas_src>
from functools import partial

import jax
import jax.numpy as jnp
from jax.experimental import pallas as pl
from jax.experimental.pallas import tpu as pltpu


def _round_up(n: int, m: int) -> int:
    return ((n + m - 1) // m) * m


def fire_kernel(x_ref, wsq_ref, bsq_ref, we1_ref, be1_ref, we3_ref, be3_ref,
                cmask_ref, out_ref, acc_ref, *, H, W, e1p):
    # x_ref:    (1, Cin, HW)          one batch element, NC(HW) layout
    # wsq_ref:  (Sqp, Cin)   bsq_ref: (Sqp, 1)
    # we1_ref:  (E1p, Sqp)   be1_ref: (E1p, 1)
    # we3_ref:  (9, E3p, Sqp) be3_ref: (E3p, 1)   (tap index = ky*3 + kx)
    # cmask_ref:(2, HW)  row 0: 1.0 where w > 0   (valid source for dx = -1)
    #                    row 1: 1.0 where w < W-1 (valid source for dx = +1)
    # out_ref:  (1, E1p + E3p, HW)
    # acc_ref:  (E3p, HW) float32 VMEM scratch accumulator
    HW = H * W
    x = x_ref[0]                                          # (Cin, HW)

    # --- squeeze: 1x1 conv + ReLU (channels on sublanes, pixels on lanes) ---
    s = jnp.dot(wsq_ref[...], x, preferred_element_type=jnp.float32)
    s = jnp.maximum(s + bsq_ref[...], 0.0)                # (Sqp, HW)

    # --- expand1x1: 1x1 conv + ReLU, stored straight into out[:, :E1p] ---
    e1 = jnp.dot(we1_ref[...], s, preferred_element_type=jnp.float32)
    e1 = jnp.maximum(e1 + be1_ref[...], 0.0)              # (E1p, HW)
    out_ref[0, :e1p, :] = e1.astype(out_ref.dtype)

    # --- expand3x3: 3x3 conv (padding=1) + ReLU ---
    # Zero-fill lane shift: t[:, p] = a[:, p + d] for 0 <= p + d < HW, else 0.
    def flat_shift(a, d):
        if d == 0:
            return a
        z = jnp.zeros((a.shape[0], abs(d)), a.dtype)
        if d > 0:
            return jnp.concatenate([a[:, d:], z], axis=1)
        return jnp.concatenate([z, a[:, :HW + d]], axis=1)

    cm = cmask_ref[...]                                   # (2, HW)
    # Column-shifted (kx) variants of s, masked so row wrap-around reads are 0.
    s_cols = (flat_shift(s, -1) * cm[0:1, :],             # dx = -1
              s,                                          # dx =  0
              flat_shift(s, +1) * cm[1:2, :])             # dx = +1

    first = True
    for ky in range(3):
        dy = ky - 1
        for kx in range(3):
            # Row shift (dy*W) with zero fill handles the h boundary exactly.
            tap = jnp.dot(we3_ref[ky * 3 + kx],
                          flat_shift(s_cols[kx], dy * W),
                          preferred_element_type=jnp.float32)
            if first:
                acc_ref[...] = tap
                first = False
            else:
                acc_ref[...] += tap

    e3 = jnp.maximum(acc_ref[...] + be3_ref[...], 0.0)    # (E3p, HW)
    out_ref[0, e1p:, :] = e3.astype(out_ref.dtype)


def fire_forward(x_nchw, w_sq, b_sq, w_e1, b_e1, w_e3, b_e3):
    """Fire forward pass.

    x_nchw: (B, Cin, H, W)
    w_sq: (Sq, Cin, 1, 1), b_sq: (Sq,)        -- squeeze 1x1 conv
    w_e1: (E1, Sq, 1, 1), b_e1: (E1,)         -- expand1x1 conv
    w_e3: (E3, Sq, 3, 3), b_e3: (E3,)         -- expand3x3 conv (padding=1)
    Returns (B, E1+E3, H, W), matching the torch Fire module.
    """
    B, Cin, H, W = x_nchw.shape
    Sq, E1, E3 = w_sq.shape[0], w_e1.shape[0], w_e3.shape[0]
    HW = H * W

    SUB = 8  # sublane granularity (f32); channel dims padded to multiples of 8
    Sqp, E1p, E3p = _round_up(Sq, SUB), _round_up(E1, SUB), _round_up(E3, SUB)
    Coutp = E1p + E3p

    f32 = jnp.float32
    # Weight / bias re-layout (tiny, done once; zero padding so padded
    # channels contribute exactly zero after ReLU).
    wsq = jnp.pad(w_sq.reshape(Sq, Cin).astype(f32), ((0, Sqp - Sq), (0, 0)))
    bsq = jnp.pad(b_sq.astype(f32), (0, Sqp - Sq)).reshape(Sqp, 1)
    we1 = jnp.pad(w_e1.reshape(E1, Sq).astype(f32),
                  ((0, E1p - E1), (0, Sqp - Sq)))
    be1 = jnp.pad(b_e1.astype(f32), (0, E1p - E1)).reshape(E1p, 1)
    we3 = jnp.pad(jnp.transpose(w_e3, (2, 3, 0, 1)).reshape(9, E3, Sq).astype(f32),
                  ((0, 0), (0, E3p - E3), (0, Sqp - Sq)))
    be3 = jnp.pad(b_e3.astype(f32), (0, E3p - E3)).reshape(E3p, 1)

    # Column-boundary masks for the 3x3 dx=+-1 taps (built once outside).
    w_ids = jnp.arange(HW, dtype=jnp.int32) % W
    cmask = jnp.stack([(w_ids > 0), (w_ids < W - 1)]).astype(f32)   # (2, HW)

    # Free reshape: NCHW -> (B, Cin, H*W).  No transposes anywhere.
    x2 = x_nchw.reshape(B, Cin, HW)

    kernel = partial(fire_kernel, H=H, W=W, e1p=E1p)

    # Weights/biases/mask use constant index_maps, so Pallas keeps them
    # resident in VMEM across the batch grid loop (no per-step re-DMA).
    # NOTE: for very large H*W one would add a "parallel" spatial grid axis
    # (row tiles with a +-1-row halo) to bound per-step VMEM on v7x.
    out = pl.pallas_call(
        kernel,
        out_shape=jax.ShapeDtypeStruct((B, Coutp, HW), x_nchw.dtype),
        grid_spec=pltpu.PrefetchScalarGridSpec(
            num_scalar_prefetch=0,
            grid=(B,),
            in_specs=[
                pl.BlockSpec((1, Cin, HW), lambda b: (b, 0, 0)),
                pl.BlockSpec((Sqp, Cin), lambda b: (0, 0)),
                pl.BlockSpec((Sqp, 1), lambda b: (0, 0)),
                pl.BlockSpec((E1p, Sqp), lambda b: (0, 0)),
                pl.BlockSpec((E1p, 1), lambda b: (0, 0)),
                pl.BlockSpec((9, E3p, Sqp), lambda b: (0, 0, 0)),
                pl.BlockSpec((E3p, 1), lambda b: (0, 0)),
                pl.BlockSpec((2, HW), lambda b: (0, 0)),
            ],
            out_specs=pl.BlockSpec((1, Coutp, HW), lambda b: (b, 0, 0)),
            scratch_shapes=[pltpu.VMEM((E3p, HW), jnp.float32)],
        ),
        compiler_params=pltpu.CompilerParams(
            dimension_semantics=("parallel",)),
    )(x2, wsq, bsq, we1, be1, we3, be3, cmask)

    # Strip channel padding (no-op when E1/E3 are already multiples of 8).
    if E1p == E1 and E3p == E3:
        out_c = out
    else:
        out_c = jnp.concatenate([out[:, :E1, :], out[:, E1p:E1p + E3, :]],
                                axis=1)
    return out_c.reshape(B, E1 + E3, H, W)


def fire_reference(x_nchw, w_sq_oihw, b_sq, w_e1_oihw, b_e1, w_e3_oihw, b_e3):
    """Pure-JAX NCHW reference identical to the torch module semantics."""
    def conv(x, w, b, pad):
        y = jax.lax.conv_general_dilated(
            x, w, window_strides=(1, 1), padding=pad,
            dimension_numbers=("NCHW", "OIHW", "NCHW"))
        return y + b[None, :, None, None]

    s = jax.nn.relu(conv(x_nchw, w_sq_oihw, b_sq, "VALID"))
    e1 = jax.nn.relu(conv(s, w_e1_oihw, b_e1, "VALID"))
    e3 = jax.nn.relu(conv(s, w_e3_oihw, b_e3, [(1, 1), (1, 1)]))
    return jnp.concatenate([e1, e3], axis=1)


if __name__ == "__main__":
    # Small Fire config: inplanes=4, squeeze=4, expand1x1=8, expand3x3=8
    B, Cin, H, W = 2, 4, 16, 16
    Sq, E1, E3 = 4, 8, 8

    key = jax.random.PRNGKey(0)
    keys = jax.random.split(key, 7)

    # Deterministic synthetic parameters in PyTorch Conv2d layout (OIHW).
    w_sq = 0.1 * jax.random.normal(keys[0], (Sq, Cin, 1, 1), jnp.float32)
    b_sq = 0.1 * jax.random.normal(keys[1], (Sq,), jnp.float32)
    w_e1 = 0.1 * jax.random.normal(keys[2], (E1, Sq, 1, 1), jnp.float32)
    b_e1 = 0.1 * jax.random.normal(keys[3], (E1,), jnp.float32)
    w_e3 = 0.1 * jax.random.normal(keys[4], (E3, Sq, 3, 3), jnp.float32)
    b_e3 = 0.1 * jax.random.normal(keys[5], (E3,), jnp.float32)

    x = jax.random.normal(keys[6], (B, Cin, H, W), jnp.float32)

    out = fire_forward(x, w_sq, b_sq, w_e1, b_e1, w_e3, b_e3)
    out = jax.block_until_ready(out)

    ref = fire_reference(x, w_sq, b_sq, w_e1, b_e1, w_e3, b_e3)
    assert out.shape == (B, E1 + E3, H, W), out.shape
    assert jnp.allclose(out, ref, atol=1e-4, rtol=1e-4), \
        float(jnp.max(jnp.abs(out - ref)))

    print("KERNEL_OK")
</pallas_src>

<mosaic_0001>
module attributes {stable_mosaic.version = 11 : i64} {
  func.func @fire_kernel(%arg0: i32, %arg1: memref<1x4x256xf32, #tpu.memory_space<vmem>>, %arg2: memref<8x4xf32, #tpu.memory_space<vmem>>, %arg3: memref<8x1xf32, #tpu.memory_space<vmem>>, %arg4: memref<8x8xf32, #tpu.memory_space<vmem>>, %arg5: memref<8x1xf32, #tpu.memory_space<vmem>>, %arg6: memref<9x8x8xf32, #tpu.memory_space<vmem>>, %arg7: memref<8x1xf32, #tpu.memory_space<vmem>>, %arg8: memref<2x256xf32, #tpu.memory_space<vmem>>, %arg9: memref<1x16x256xf32, #tpu.memory_space<vmem>>, %arg10: memref<8x256xf32, #tpu.memory_space<vmem>>) attributes {dimension_semantics = [#tpu.dimension_semantics<parallel>], iteration_bounds = array<i64: 2>, scalar_prefetch = 0 : i64, scratch_operands = 1 : i64, tpu.core_type = #tpu.core_type<tc>, window_params = [{transform_indices = @transform_0, window_bounds = array<i64: 1, 4, 256>}, {pipeline_mode = #tpu.pipeline_mode<synchronous>, transform_indices = @transform_1, window_bounds = array<i64: 8, 4>}, {pipeline_mode = #tpu.pipeline_mode<synchronous>, transform_indices = @transform_2, window_bounds = array<i64: 8, 1>}, {pipeline_mode = #tpu.pipeline_mode<synchronous>, transform_indices = @transform_3, window_bounds = array<i64: 8, 8>}, {pipeline_mode = #tpu.pipeline_mode<synchronous>, transform_indices = @transform_4, window_bounds = array<i64: 8, 1>}, {pipeline_mode = #tpu.pipeline_mode<synchronous>, transform_indices = @transform_5, window_bounds = array<i64: 9, 8, 8>}, {pipeline_mode = #tpu.pipeline_mode<synchronous>, transform_indices = @transform_6, window_bounds = array<i64: 8, 1>}, {pipeline_mode = #tpu.pipeline_mode<synchronous>, transform_indices = @transform_7, window_bounds = array<i64: 2, 256>}, {transform_indices = @transform_8, window_bounds = array<i64: 1, 16, 256>}]} {
    %c0 = arith.constant 0 : index
    %c0_0 = arith.constant 0 : index
    %c0_1 = arith.constant 0 : index
    %0 = vector.load %arg1[%c0, %c0_0, %c0_1] : memref<1x4x256xf32, #tpu.memory_space<vmem>>, vector<1x4x256xf32>
    %1 = vector.shape_cast %0 : vector<1x4x256xf32> to vector<4x256xf32>
    %c0_2 = arith.constant 0 : index
    %c0_3 = arith.constant 0 : index
    %2 = vector.load %arg2[%c0_2, %c0_3] : memref<8x4xf32, #tpu.memory_space<vmem>>, vector<8x4xf32>
    %cst = arith.constant dense<0.000000e+00> : vector<8x256xf32>
    %3 = tpu.matmul %2, %1, %cst {dimension_numbers = #tpu.dot_dimension_numbers<[1], [0], [0], [1], [0, 0, 1, 1], [], []>} : vector<8x4xf32>, vector<4x256xf32>, vector<8x256xf32> -> vector<8x256xf32>
    %c0_4 = arith.constant 0 : index
    %c0_5 = arith.constant 0 : index
    %4 = vector.load %arg3[%c0_4, %c0_5] : memref<8x1xf32, #tpu.memory_space<vmem>>, vector<8x1xf32>
    %5 = vector.broadcast %4 : vector<8x1xf32> to vector<8x256xf32>
    %6 = arith.addf %3, %5 : vector<8x256xf32>
    %cst_6 = arith.constant 0.000000e+00 : f32
    %7 = vector.broadcast %cst_6 : f32 to vector<8x256xf32>
    %8 = arith.maximumf %6, %7 : vector<8x256xf32>
    %c0_7 = arith.constant 0 : index
    %c0_8 = arith.constant 0 : index
    %9 = vector.load %arg4[%c0_7, %c0_8] : memref<8x8xf32, #tpu.memory_space<vmem>>, vector<8x8xf32>
    %cst_9 = arith.constant dense<0.000000e+00> : vector<8x256xf32>
    %10 = tpu.matmul %9, %8, %cst_9 {dimension_numbers = #tpu.dot_dimension_numbers<[1], [0], [0], [1], [0, 0, 1, 1], [], []>} : vector<8x8xf32>, vector<8x256xf32>, vector<8x256xf32> -> vector<8x256xf32>
    %c0_10 = arith.constant 0 : index
    %c0_11 = arith.constant 0 : index
    %11 = vector.load %arg5[%c0_10, %c0_11] : memref<8x1xf32, #tpu.memory_space<vmem>>, vector<8x1xf32>
    %12 = vector.broadcast %11 : vector<8x1xf32> to vector<8x256xf32>
    %13 = arith.addf %10, %12 : vector<8x256xf32>
    %cst_12 = arith.constant 0.000000e+00 : f32
    %14 = vector.broadcast %cst_12 : f32 to vector<8x256xf32>
    %15 = arith.maximumf %13, %14 : vector<8x256xf32>
    %c0_13 = arith.constant 0 : index
    %c0_14 = arith.constant 0 : index
    %c0_15 = arith.constant 0 : index
    %16 = vector.load %arg9[%c0_13, %c0_14, %c0_15] : memref<1x16x256xf32, #tpu.memory_space<vmem>>, vector<1x8x256xf32>
    %17 = vector.shape_cast %16 : vector<1x8x256xf32> to vector<8x256xf32>
    %18 = vector.shape_cast %15 : vector<8x256xf32> to vector<1x8x256xf32>
    tpu.vector_store %arg9[%c0_13, %c0_14, %c0_15], %18 {strides = array<i32>} : memref<1x16x256xf32, #tpu.memory_space<vmem>>, vector<1x8x256xf32>,
    %c0_16 = arith.constant 0 : index
    %c0_17 = arith.constant 0 : index
    %19 = vector.load %arg8[%c0_16, %c0_17] : memref<2x256xf32, #tpu.memory_space<vmem>>, vector<2x256xf32>
    %cst_18 = arith.constant 0.000000e+00 : f32
    %20 = vector.broadcast %cst_18 : f32 to vector<8x1xf32>
    %21 = vector.extract_strided_slice %8 {offsets = [0, 0], sizes = [8, 255], strides = [1, 1]} : vector<8x256xf32> to vector<8x255xf32>
    %22 = tpu.concatenate %20, %21 in 1 : vector<8x1xf32>, vector<8x255xf32> -> vector<8x256xf32>
    %23 = vector.extract_strided_slice %19 {offsets = [0, 0], sizes = [1, 256], strides = [1, 1]} : vector<2x256xf32> to vector<1x256xf32>
    %24 = vector.broadcast %23 : vector<1x256xf32> to vector<8x256xf32>
    %25 = arith.mulf %22, %24 : vector<8x256xf32>
    %cst_19 = arith.constant 0.000000e+00 : f32
    %26 = vector.broadcast %cst_19 : f32 to vector<8x1xf32>
    %27 = vector.extract_strided_slice %8 {offsets = [0, 1], sizes = [8, 255], strides = [1, 1]} : vector<8x256xf32> to vector<8x255xf32>
    %28 = tpu.concatenate %27, %26 in 1 : vector<8x255xf32>, vector<8x1xf32> -> vector<8x256xf32>
    %29 = vector.extract_strided_slice %19 {offsets = [1, 0], sizes = [1, 256], strides = [1, 1]} : vector<2x256xf32> to vector<1x256xf32>
    %30 = vector.broadcast %29 : vector<1x256xf32> to vector<8x256xf32>
    %31 = arith.mulf %28, %30 : vector<8x256xf32>
    %c0_20 = arith.constant 0 : index
    %c0_21 = arith.constant 0 : index
    %c0_22 = arith.constant 0 : index
    %32 = vector.load %arg6[%c0_20, %c0_21, %c0_22] : memref<9x8x8xf32, #tpu.memory_space<vmem>>, vector<1x8x8xf32>
    %33 = vector.shape_cast %32 : vector<1x8x8xf32> to vector<8x8xf32>
    %cst_23 = arith.constant 0.000000e+00 : f32
    %34 = vector.broadcast %cst_23 : f32 to vector<8x16xf32>
    %35 = vector.extract_strided_slice %25 {offsets = [0, 0], sizes = [8, 240], strides = [1, 1]} : vector<8x256xf32> to vector<8x240xf32>
    %36 = tpu.concatenate %34, %35 in 1 : vector<8x16xf32>, vector<8x240xf32> -> vector<8x256xf32>
    %cst_24 = arith.constant dense<0.000000e+00> : vector<8x256xf32>
    %37 = tpu.matmul %33, %36, %cst_24 {dimension_numbers = #tpu.dot_dimension_numbers<[1], [0], [0], [1], [0, 0, 1, 1], [], []>} : vector<8x8xf32>, vector<8x256xf32>, vector<8x256xf32> -> vector<8x256xf32>
    %c0_25 = arith.constant 0 : index
    %c0_26 = arith.constant 0 : index
    %38 = vector.load %arg10[%c0_25, %c0_26] : memref<8x256xf32, #tpu.memory_space<vmem>>, vector<8x256xf32>
    tpu.vector_store %arg10[%c0_25, %c0_26], %37 {strides = array<i32>} : memref<8x256xf32, #tpu.memory_space<vmem>>, vector<8x256xf32>,
    %c1 = arith.constant 1 : index
    %c0_27 = arith.constant 0 : index
    %c0_28 = arith.constant 0 : index
    %39 = vector.load %arg6[%c1, %c0_27, %c0_28] : memref<9x8x8xf32, #tpu.memory_space<vmem>>, vector<1x8x8xf32>
    %40 = vector.shape_cast %39 : vector<1x8x8xf32> to vector<8x8xf32>
    %cst_29 = arith.constant 0.000000e+00 : f32
    %41 = vector.broadcast %cst_29 : f32 to vector<8x16xf32>
    %42 = vector.extract_strided_slice %8 {offsets = [0, 0], sizes = [8, 240], strides = [1, 1]} : vector<8x256xf32> to vector<8x240xf32>
    %43 = tpu.concatenate %41, %42 in 1 : vector<8x16xf32>, vector<8x240xf32> -> vector<8x256xf32>
    %cst_30 = arith.constant dense<0.000000e+00> : vector<8x256xf32>
    %44 = tpu.matmul %40, %43, %cst_30 {dimension_numbers = #tpu.dot_dimension_numbers<[1], [0], [0], [1], [0, 0, 1, 1], [], []>} : vector<8x8xf32>, vector<8x256xf32>, vector<8x256xf32> -> vector<8x256xf32>
    %c0_31 = arith.constant 0 : index
    %c0_32 = arith.constant 0 : index
    %45 = vector.load %arg10[%c0_31, %c0_32] : memref<8x256xf32, #tpu.memory_space<vmem>>, vector<8x256xf32>
    %46 = arith.addf %45, %44 : vector<8x256xf32>
    %c0_33 = arith.constant 0 : index
    %c0_34 = arith.constant 0 : index
    %47 = vector.load %arg10[%c0_33, %c0_34] : memref<8x256xf32, #tpu.memory_space<vmem>>, vector<8x256xf32>
    tpu.vector_store %arg10[%c0_33, %c0_34], %46 {strides = array<i32>} : memref<8x256xf32, #tpu.memory_space<vmem>>, vector<8x256xf32>,
    %c2 = arith.constant 2 : index
    %c0_35 = arith.constant 0 : index
    %c0_36 = arith.constant 0 : index
    %48 = vector.load %arg6[%c2, %c0_35, %c0_36] : memref<9x8x8xf32, #tpu.memory_space<vmem>>, vector<1x8x8xf32>
    %49 = vector.shape_cast %48 : vector<1x8x8xf32> to vector<8x8xf32>
    %cst_37 = arith.constant 0.000000e+00 : f32
    %50 = vector.broadcast %cst_37 : f32 to vector<8x16xf32>
    %51 = vector.extract_strided_slice %31 {offsets = [0, 0], sizes = [8, 240], strides = [1, 1]} : vector<8x256xf32> to vector<8x240xf32>
    %52 = tpu.concatenate %50, %51 in 1 : vector<8x16xf32>, vector<8x240xf32> -> vector<8x256xf32>
    %cst_38 = arith.constant dense<0.000000e+00> : vector<8x256xf32>
    %53 = tpu.matmul %49, %52, %cst_38 {dimension_numbers = #tpu.dot_dimension_numbers<[1], [0], [0], [1], [0, 0, 1, 1], [], []>} : vector<8x8xf32>, vector<8x256xf32>, vector<8x256xf32> -> vector<8x256xf32>
    %c0_39 = arith.constant 0 : index
    %c0_40 = arith.constant 0 : index
    %54 = vector.load %arg10[%c0_39, %c0_40] : memref<8x256xf32, #tpu.memory_space<vmem>>, vector<8x256xf32>
    %55 = arith.addf %54, %53 : vector<8x256xf32>
    %c0_41 = arith.constant 0 : index
    %c0_42 = arith.constant 0 : index
    %56 = vector.load %arg10[%c0_41, %c0_42] : memref<8x256xf32, #tpu.memory_space<vmem>>, vector<8x256xf32>
    tpu.vector_store %arg10[%c0_41, %c0_42], %55 {strides = array<i32>} : memref<8x256xf32, #tpu.memory_space<vmem>>, vector<8x256xf32>,
    %c3 = arith.constant 3 : index
    %c0_43 = arith.constant 0 : index
    %c0_44 = arith.constant 0 : index
    %57 = vector.load %arg6[%c3, %c0_43, %c0_44] : memref<9x8x8xf32, #tpu.memory_space<vmem>>, vector<1x8x8xf32>
    %58 = vector.shape_cast %57 : vector<1x8x8xf32> to vector<8x8xf32>
    %cst_45 = arith.constant dense<0.000000e+00> : vector<8x256xf32>
    %59 = tpu.matmul %58, %25, %cst_45 {dimension_numbers = #tpu.dot_dimension_numbers<[1], [0], [0], [1], [0, 0, 1, 1], [], []>} : vector<8x8xf32>, vector<8x256xf32>, vector<8x256xf32> -> vector<8x256xf32>
    %c0_46 = arith.constant 0 : index
    %c0_47 = arith.constant 0 : index
    %60 = vector.load %arg10[%c0_46, %c0_47] : memref<8x256xf32, #tpu.memory_space<vmem>>, vector<8x256xf32>
    %61 = arith.addf %60, %59 : vector<8x256xf32>
    %c0_48 = arith.constant 0 : index
    %c0_49 = arith.constant 0 : index
    %62 = vector.load %arg10[%c0_48, %c0_49] : memref<8x256xf32, #tpu.memory_space<vmem>>, vector<8x256xf32>
    tpu.vector_store %arg10[%c0_48, %c0_49], %61 {strides = array<i32>} : memref<8x256xf32, #tpu.memory_space<vmem>>, vector<8x256xf32>,
    %c4 = arith.constant 4 : index
    %c0_50 = arith.constant 0 : index
    %c0_51 = arith.constant 0 : index
    %63 = vector.load %arg6[%c4, %c0_50, %c0_51] : memref<9x8x8xf32, #tpu.memory_space<vmem>>, vector<1x8x8xf32>
    %64 = vector.shape_cast %63 : vector<1x8x8xf32> to vector<8x8xf32>
    %cst_52 = arith.constant dense<0.000000e+00> : vector<8x256xf32>
    %65 = tpu.matmul %64, %8, %cst_52 {dimension_numbers = #tpu.dot_dimension_numbers<[1], [0], [0], [1], [0, 0, 1, 1], [], []>} : vector<8x8xf32>, vector<8x256xf32>, vector<8x256xf32> -> vector<8x256xf32>
    %c0_53 = arith.constant 0 : index
    %c0_54 = arith.constant 0 : index
    %66 = vector.load %arg10[%c0_53, %c0_54] : memref<8x256xf32, #tpu.memory_space<vmem>>, vector<8x256xf32>
    %67 = arith.addf %66, %65 : vector<8x256xf32>
    %c0_55 = arith.constant 0 : index
    %c0_56 = arith.constant 0 : index
    %68 = vector.load %arg10[%c0_55, %c0_56] : memref<8x256xf32, #tpu.memory_space<vmem>>, vector<8x256xf32>
    tpu.vector_store %arg10[%c0_55, %c0_56], %67 {strides = array<i32>} : memref<8x256xf32, #tpu.memory_space<vmem>>, vector<8x256xf32>,
    %c5 = arith.constant 5 : index
    %c0_57 = arith.constant 0 : index
    %c0_58 = arith.constant 0 : index
    %69 = vector.load %arg6[%c5, %c0_57, %c0_58] : memref<9x8x8xf32, #tpu.memory_space<vmem>>, vector<1x8x8xf32>
    %70 = vector.shape_cast %69 : vector<1x8x8xf32> to vector<8x8xf32>
    %cst_59 = arith.constant dense<0.000000e+00> : vector<8x256xf32>
    %71 = tpu.matmul %70, %31, %cst_59 {dimension_numbers = #tpu.dot_dimension_numbers<[1], [0], [0], [1], [0, 0, 1, 1], [], []>} : vector<8x8xf32>, vector<8x256xf32>, vector<8x256xf32> -> vector<8x256xf32>
    %c0_60 = arith.constant 0 : index
    %c0_61 = arith.constant 0 : index
    %72 = vector.load %arg10[%c0_60, %c0_61] : memref<8x256xf32, #tpu.memory_space<vmem>>, vector<8x256xf32>
    %73 = arith.addf %72, %71 : vector<8x256xf32>
    %c0_62 = arith.constant 0 : index
    %c0_63 = arith.constant 0 : index
    %74 = vector.load %arg10[%c0_62, %c0_63] : memref<8x256xf32, #tpu.memory_space<vmem>>, vector<8x256xf32>
    tpu.vector_store %arg10[%c0_62, %c0_63], %73 {strides = array<i32>} : memref<8x256xf32, #tpu.memory_space<vmem>>, vector<8x256xf32>,
    %c6 = arith.constant 6 : index
    %c0_64 = arith.constant 0 : index
    %c0_65 = arith.constant 0 : index
    %75 = vector.load %arg6[%c6, %c0_64, %c0_65] : memref<9x8x8xf32, #tpu.memory_space<vmem>>, vector<1x8x8xf32>
    %76 = vector.shape_cast %75 : vector<1x8x8xf32> to vector<8x8xf32>
    %cst_66 = arith.constant 0.000000e+00 : f32
    %77 = vector.broadcast %cst_66 : f32 to vector<8x16xf32>
    %78 = vector.extract_strided_slice %25 {offsets = [0, 16], sizes = [8, 240], strides = [1, 1]} : vector<8x256xf32> to vector<8x240xf32>
    %79 = tpu.concatenate %78, %77 in 1 : vector<8x240xf32>, vector<8x16xf32> -> vector<8x256xf32>
    %cst_67 = arith.constant dense<0.000000e+00> : vector<8x256xf32>
    %80 = tpu.matmul %76, %79, %cst_67 {dimension_numbers = #tpu.dot_dimension_numbers<[1], [0], [0], [1], [0, 0, 1, 1], [], []>} : vector<8x8xf32>, vector<8x256xf32>, vector<8x256xf32> -> vector<8x256xf32>
    %c0_68 = arith.constant 0 : index
    %c0_69 = arith.constant 0 : index
    %81 = vector.load %arg10[%c0_68, %c0_69] : memref<8x256xf32, #tpu.memory_space<vmem>>, vector<8x256xf32>
    %82 = arith.addf %81, %80 : vector<8x256xf32>
    %c0_70 = arith.constant 0 : index
    %c0_71 = arith.constant 0 : index
    %83 = vector.load %arg10[%c0_70, %c0_71] : memref<8x256xf32, #tpu.memory_space<vmem>>, vector<8x256xf32>
    tpu.vector_store %arg10[%c0_70, %c0_71], %82 {strides = array<i32>} : memref<8x256xf32, #tpu.memory_space<vmem>>, vector<8x256xf32>,
    %c7 = arith.constant 7 : index
    %c0_72 = arith.constant 0 : index
    %c0_73 = arith.constant 0 : index
    %84 = vector.load %arg6[%c7, %c0_72, %c0_73] : memref<9x8x8xf32, #tpu.memory_space<vmem>>, vector<1x8x8xf32>
    %85 = vector.shape_cast %84 : vector<1x8x8xf32> to vector<8x8xf32>
    %cst_74 = arith.constant 0.000000e+00 : f32
    %86 = vector.broadcast %cst_74 : f32 to vector<8x16xf32>
    %87 = vector.extract_strided_slice %8 {offsets = [0, 16], sizes = [8, 240], strides = [1, 1]} : vector<8x256xf32> to vector<8x240xf32>
    %88 = tpu.concatenate %87, %86 in 1 : vector<8x240xf32>, vector<8x16xf32> -> vector<8x256xf32>
    %cst_75 = arith.constant dense<0.000000e+00> : vector<8x256xf32>
    %89 = tpu.matmul %85, %88, %cst_75 {dimension_numbers = #tpu.dot_dimension_numbers<[1], [0], [0], [1], [0, 0, 1, 1], [], []>} : vector<8x8xf32>, vector<8x256xf32>, vector<8x256xf32> -> vector<8x256xf32>
    %c0_76 = arith.constant 0 : index
    %c0_77 = arith.constant 0 : index
    %90 = vector.load %arg10[%c0_76, %c0_77] : memref<8x256xf32, #tpu.memory_space<vmem>>, vector<8x256xf32>
    %91 = arith.addf %90, %89 : vector<8x256xf32>
    %c0_78 = arith.constant 0 : index
    %c0_79 = arith.constant 0 : index
    %92 = vector.load %arg10[%c0_78, %c0_79] : memref<8x256xf32, #tpu.memory_space<vmem>>, vector<8x256xf32>
    tpu.vector_store %arg10[%c0_78, %c0_79], %91 {strides = array<i32>} : memref<8x256xf32, #tpu.memory_space<vmem>>, vector<8x256xf32>,
    %c8 = arith.constant 8 : index
    %c0_80 = arith.constant 0 : index
    %c0_81 = arith.constant 0 : index
    %93 = vector.load %arg6[%c8, %c0_80, %c0_81] : memref<9x8x8xf32, #tpu.memory_space<vmem>>, vector<1x8x8xf32>
    %94 = vector.shape_cast %93 : vector<1x8x8xf32> to vector<8x8xf32>
    %cst_82 = arith.constant 0.000000e+00 : f32
    %95 = vector.broadcast %cst_82 : f32 to vector<8x16xf32>
    %96 = vector.extract_strided_slice %31 {offsets = [0, 16], sizes = [8, 240], strides = [1, 1]} : vector<8x256xf32> to vector<8x240xf32>
    %97 = tpu.concatenate %96, %95 in 1 : vector<8x240xf32>, vector<8x16xf32> -> vector<8x256xf32>
    %cst_83 = arith.constant dense<0.000000e+00> : vector<8x256xf32>
    %98 = tpu.matmul %94, %97, %cst_83 {dimension_numbers = #tpu.dot_dimension_numbers<[1], [0], [0], [1], [0, 0, 1, 1], [], []>} : vector<8x8xf32>, vector<8x256xf32>, vector<8x256xf32> -> vector<8x256xf32>
    %c0_84 = arith.constant 0 : index
    %c0_85 = arith.constant 0 : index
    %99 = vector.load %arg10[%c0_84, %c0_85] : memref<8x256xf32, #tpu.memory_space<vmem>>, vector<8x256xf32>
    %100 = arith.addf %99, %98 : vector<8x256xf32>
    %c0_86 = arith.constant 0 : index
    %c0_87 = arith.constant 0 : index
    %101 = vector.load %arg10[%c0_86, %c0_87] : memref<8x256xf32, #tpu.memory_space<vmem>>, vector<8x256xf32>
    tpu.vector_store %arg10[%c0_86, %c0_87], %100 {strides = array<i32>} : memref<8x256xf32, #tpu.memory_space<vmem>>, vector<8x256xf32>,
    %c0_88 = arith.constant 0 : index
    %c0_89 = arith.constant 0 : index
    %102 = vector.load %arg10[%c0_88, %c0_89] : memref<8x256xf32, #tpu.memory_space<vmem>>, vector<8x256xf32>
    %c0_90 = arith.constant 0 : index
    %c0_91 = arith.constant 0 : index
    %103 = vector.load %arg7[%c0_90, %c0_91] : memref<8x1xf32, #tpu.memory_space<vmem>>, vector<8x1xf32>
    %104 = vector.broadcast %103 : vector<8x1xf32> to vector<8x256xf32>
    %105 = arith.addf %102, %104 : vector<8x256xf32>
    %cst_92 = arith.constant 0.000000e+00 : f32
    %106 = vector.broadcast %cst_92 : f32 to vector<8x256xf32>
    %107 = arith.maximumf %105, %106 : vector<8x256xf32>
    %c0_93 = arith.constant 0 : index
    %c8_94 = arith.constant 8 : index
    %c0_95 = arith.constant 0 : index
    %108 = vector.load %arg9[%c0_93, %c8_94, %c0_95] : memref<1x16x256xf32, #tpu.memory_space<vmem>>, vector<1x8x256xf32>
    %109 = vector.shape_cast %108 : vector<1x8x256xf32> to vector<8x256xf32>
    %110 = vector.shape_cast %107 : vector<8x256xf32> to vector<1x8x256xf32>
    tpu.vector_store %arg9[%c0_93, %c8_94, %c0_95], %110 {strides = array<i32>} : memref<1x16x256xf32, #tpu.memory_space<vmem>>, vector<1x8x256xf32>,
    return
  }
  func.func @transform_0(%arg0: i32) -> (i32, i32, i32) {
    %c0_i32 = arith.constant 0 : i32
    %c0_i32_0 = arith.constant 0 : i32
    %c0_i32_1 = arith.constant 0 : i32
    return %arg0, %c0_i32, %c0_i32_0 : i32, i32, i32
  }
  func.func @transform_1(%arg0: i32) -> (i32, i32) {
    %c0_i32 = arith.constant 0 : i32
    %c0_i32_0 = arith.constant 0 : i32
    %c0_i32_1 = arith.constant 0 : i32
    return %c0_i32, %c0_i32_0 : i32, i32
  }
  func.func @transform_2(%arg0: i32) -> (i32, i32) {
    %c0_i32 = arith.constant 0 : i32
    %c0_i32_0 = arith.constant 0 : i32
    %c0_i32_1 = arith.constant 0 : i32
    return %c0_i32, %c0_i32_0 : i32, i32
  }
  func.func @transform_3(%arg0: i32) -> (i32, i32) {
    %c0_i32 = arith.constant 0 : i32
    %c0_i32_0 = arith.constant 0 : i32
    %c0_i32_1 = arith.constant 0 : i32
    return %c0_i32, %c0_i32_0 : i32, i32
  }
  func.func @transform_4(%arg0: i32) -> (i32, i32) {
    %c0_i32 = arith.constant 0 : i32
    %c0_i32_0 = arith.constant 0 : i32
    %c0_i32_1 = arith.constant 0 : i32
    return %c0_i32, %c0_i32_0 : i32, i32
  }
  func.func @transform_5(%arg0: i32) -> (i32, i32, i32) {
    %c0_i32 = arith.constant 0 : i32
    %c0_i32_0 = arith.constant 0 : i32
    %c0_i32_1 = arith.constant 0 : i32
    %c0_i32_2 = arith.constant 0 : i32
    return %c0_i32, %c0_i32_0, %c0_i32_1 : i32, i32, i32
  }
  func.func @transform_6(%arg0: i32) -> (i32, i32) {
    %c0_i32 = arith.constant 0 : i32
    %c0_i32_0 = arith.constant 0 : i32
    %c0_i32_1 = arith.constant 0 : i32
    return %c0_i32, %c0_i32_0 : i32, i32
  }
  func.func @transform_7(%arg0: i32) -> (i32, i32) {
    %c0_i32 = arith.constant 0 : i32
    %c0_i32_0 = arith.constant 0 : i32
    %c0_i32_1 = arith.constant 0 : i32
    return %c0_i32, %c0_i32_0 : i32, i32
  }
  func.func @transform_8(%arg0: i32) -> (i32, i32, i32) {
    %c0_i32 = arith.constant 0 : i32
    %c0_i32_0 = arith.constant 0 : i32
    %c0_i32_1 = arith.constant 0 : i32
    return %arg0, %c0_i32, %c0_i32_0 : i32, i32, i32
  }
}

</mosaic_0001>

<bundles_post_ra>
// kernel: tpu_custom_call.1
= control target key start
LH: loop header
LB: loop body
LE: loop exit
PB: predicated region body
PF: predicated region fallthrough
CT: control target
= control target key end

     0   :  { %13 = vsyncpa [#allocation4], 0  ;;  %s1845_s0 = inlined_call_operand.vmem [shape: f32[2,4,256], index: 0, kind: input, shape index: {}]   ;;  %s1846_s1 = inlined_call_operand.vmem [shape: f32[8,4], index: 1, kind: input, shape index: {}]   ;;  %s1847_s2 = inlined_call_operand.vmem [shape: f32[8,1], index: 2, kind: input, shape index: {}]   ;;  %s1848_s3 = inlined_call_operand.vmem [shape: f32[8,8], index: 3, kind: input, shape index: {}]   ;;  %s1849_s4 = inlined_call_operand.vmem [shape: f32[8,1], index: 4, kind: input, shape index: {}]   ;;  %s1850_s5 = inlined_call_operand.vmem [shape: f32[9,8,8], index: 5, kind: input, shape index: {}]   ;;  %s1851_s6 = inlined_call_operand.vmem [shape: f32[8,1], index: 6, kind: input, shape index: {}]   ;;  %s1852_s7 = inlined_call_operand.vmem [shape: f32[2,256], index: 7, kind: input, shape index: {}]   ;;  %s1853_s8 = inlined_call_operand.hbm [shape: f32[2,16,256], index: 8, kind: output, shape index: {}]  }
   0x1   :  { %15 = vsyncpa [#allocation4 + $0x1], 0  ;;  %s1647_s27 = smov 0   ;;  %s1649_s28 = smov 0  }
   0x2   :  { %s1651_s29 = smov 0   ;;  %s1653_s30 = smov 0  }
   0x3 LB: > { %s1668_s9 = sadd.s32 4294967295, %s1592_s30   ;;  %s1421_s10 = sadd.s32 4294967294, %s1592_s30   ;;  %s1592_s30 = sphi %s1653_s30, %s1861_s30   ;;  %s1588_s29 = sphi %s1651_s29, %s1860_s29   ;;  %s1584_s28 = sphi %s1649_s28, %s1859_s28   ;;  %s1580_s27 = sphi %s1647_s27, %s1858_s27  }
   0x4   : > { %s1672_s11 = sadd.s32 1, %s1592_s30   ;;  %s201_s12 = sadd.s32 1, %s1588_s29 }
   0x5   : > { %s198_s13 = ssub.s32 %s1592_s30, %s1672_s11  ;;  %p211_p0 = scmp.ne.s32.totalorder %s1588_s29, %s1584_s28 }
   0x6   : > { %p199_p1 = scmp.eq.s32.totalorder %s198_s13, 0  ;;  %p212_p2 = scmp.eq.s32.totalorder %s1668_s9, 1 }
   0x7   : > { %p217_p3 = scmp.ne.s32.totalorder %s1584_s28, %s1580_s27  ;;  %p218_p4 = scmp.eq.s32.totalorder %s1421_s10, 1 }
   0x8   : > { %s1683_s14 = scalar_select %p199_p1, %s1588_s29, %s201_s12  }
   0x9   : > { %p1685_p5 = por %p212_p2, %p211_p0  ;;  %p1689_p6 = por %p218_p4, %p217_p3 }
   0xa   : > { %p1424_p7 = scmp.ge.s32.totalorder %s1592_s30, 1  ;;  %p265_p8 = scmp.lt.s32.totalorder %s1592_s30, 3 }
   0xc   : > { %p266_p9 = pnand %p1424_p7, %p265_p8 }
   0xd   : > { %p299_p10 = scmp.lt.s32.totalorder (!%p266_p9), %s1668_s9, 1  ;;  %v1594_v0 = vmov (!%p266_p9), 0.0   ;;  %v1595_v1 = vmov (!%p266_p9), 0   ;;  %v306_v2 = vld [vmem:[%s1847_s2] sm:$0xff] (!%p266_p9)  ;;  %vm318_vm0 = vcmask (!%p266_p9), 1043456   ;;  %vm314_vm1 = vcmask (!%p266_p9), 31744  }
   0xe   : > { %269 = sbr.rel (%p266_p9) target bundleno = 736 (0x2e0), region = 52  ;;  %387 = vmatprep.mubr.f32.mxu1 (!%p266_p9), %v1594_v0  ;;  %1527 = vset.pattern.permute.xlu0 (!%p266_p9), %v1595_v1  ;;  %v305_v5 = vld [vmem:[%s1846_s1] sm:$0xff] (!%p266_p9)  ;;  %s1596_s26 = smov (!%p266_p9), 1   ;;  %v495_v13 = vlaneseq (!%p266_p9)  ;;  %vm403_vm2 = vcmask (!%p266_p9), 64512   ;;  %vm489_vm3 = vcmask (!%p266_p9), 7168   ;;  %vm519_vm4 = vcmask (!%p266_p9), 1039360  }
   0xf   : > { %309 = vperm.xlu0 (!%p266_p9), %1527, %v306_v2   ;;  %883 = vmatprep.mubr.f32.mxu0 (!%p266_p9), %v1594_v0  ;;  %s1597_s10 = smov (!%p266_p9), 127   ;;  %v482_v16 = vld [vmem:[%s1852_s7] sm:$0xf] (!%p266_p9)  ;;  %v1443_v34 = vld [vmem:[%s1850_s5 + $0x18] sm:$0xff] (!%p266_p9)  ;;  %s1599_s22 = smov (!%p266_p9), 112   ;;  %v1447_v43 = vld [vmem:[%s1850_s5 + $0x28] sm:$0xff] (!%p266_p9) }
  0x10   : > { %1528 = vset.pattern.permute.xlu1 (!%p266_p9), %v1595_v1  ;;  %v496_v14 = vshrl.u32 (!%p266_p9), %v495_v13, 7  ;;  %v396_v18 = vld [vmem:[%s1848_s3] sm:$0xff] (!%p266_p9)  ;;  %vm551_vm5 = vcmask (!%p266_p9), 130048   ;;  %vm1066_vm7 = vcmask (!%p266_p9), 916480   ;;  %v1449_v53 = vld [vmem:[%s1850_s5 + $0x30] sm:$0xff] (!%p266_p9)  ;;  %v1435_v58 = vld [vmem:[%s1850_s5 + $0x8] sm:$0xff] (!%p266_p9) }
  0x11   : > { %v1445_v41 = vld [vmem:[%s1850_s5 + $0x20] sm:$0xff] (!%p266_p9)  ;;  %vm1747_vm6 = vmneg (!%p266_p9), %vm551_vm5  ;;  %v1452_v61 = vld [vmem:[%s1850_s5 + $0x38] sm:$0xff] (!%p266_p9)  ;;  %s296_s18 = sand.u32 (!%p266_p9), 1, %s1584_s28  }
  0x12   : > { %v497_v15 = vsub.s32 (!%p266_p9), 0, %v496_v14  ;;  %v501_v17 = vsub.s32 (!%p266_p9), 2, %v496_v14  ;;  %v530_v20 = vsub.s32 (!%p266_p9), 3, %v496_v14  ;;  %v526_v23 = vsub.s32 (!%p266_p9), 1, %v496_v14  ;;  %v1333_v44 = vld [vmem:[%s1851_s6] sm:$0xff] (!%p266_p9) }
  0x13   : > { %v397_v45 = vld [vmem:[%s1849_s4] sm:$0xff] (!%p266_p9) }
  0x14   : > { %v498_v19 = vrot.slane (!%p266_p9), %v482_v16, %v497_v15  ;;  %v502_v21 = vrot.slane (!%p266_p9), %v482_v16, %v501_v17  ;;  %v531_v24 = vrot.slane (!%p266_p9), %v482_v16, %v530_v20  ;;  %v527_v37 = vrot.slane (!%p266_p9), %v482_v16, %v526_v23  ;;  %v544_v50 = vld [vmem:[%s1850_s5] sm:$0xff] (!%p266_p9) }
  0x15   : > { %s300_s19 = scalar_select %p299_p10, %s1668_s9, 1 }
  0x16   : > { %v508_v22 = vrot.slane %v498_v19, %v497_v15  ;;  %v512_v25 = vrot.slane %v502_v21, %v497_v15  ;;  %v541_v31 = vrot.slane %v531_v24, %v526_v23  ;;  %v537_v39 = vrot.slane %v527_v37, %v526_v23 }
  0x17   : > { %s1463_s20 = sshll.u32 %s300_s19, 3  ;;  %s1598_s19 = smov 16  }
  0x18   : > { %s303_s23 = scalar_lea.vmem %s1845_s0, %s1463_s20  ;;  %s1425_s20 = sshll.u32 %s296_s18, 5 }
  0x19   : > { %v304_v3 = vld [vmem:[%s303_s23] sm:$0xff]  ;;  %s298_s21 = scalar_lea.vmem [#allocation3], %s1425_s20  ;;  %s1464_s23 = sshll.u32 %s1668_s9, 9 }
  0x1a   : > { %v313_v4 = vcombine.high %v304_v3, %v304_v3  ;;  %s1600_s9 = smov [#allocation3]  }
  0x1b   : > { %s1534_s13 = sshll.u32 %s1600_s9, 4  ;;  %s1535_s13 = int_to_ptr.vmem [resolvable:$false] %s1534_s13 }
  0x1c   : > { %1428 = vmatprep.subr.msk.mxu1 %vm318_vm0, %v313_v4  ;;  %s1536_s17 = scalar_lea.vmem %s1535_s13, 1024 }
  0x1d   : > { %1429 = vmatpush1.msk.msra.mxu1 %vm318_vm0, %v304_v3  ;;  %v1439_v3 = vld [vmem:[%s1850_s5 + $0x10] sm:$0xff] }
  0x1e   : > { %1430 = vmatmul.mubr.msk.f32.vlgmr.msra.gmra.mrb[0].mxu1 %vm314_vm1, %v305_v5 }
  0x1f   : > { %471 = vmatprep.mubr.f32.mxu1 %v1594_v0 }
  0x8e   : > { %v310_v6 = vpop.permute.xlu0 %309 }
  0xf1   : > { %v389_v7 = vpop.f32.mrb[0].mxu1 }
  0xf2   : > { %v390_v8 = vadd.f32 %v389_v7, %v310_v6  ;;  %v391_v9 = vpop.f32.mrb[1].mxu1 }
  0xf3   : > { %v392_v10 = vadd.f32 %v391_v9, %v310_v6  ;;  %v1455_v6 = vld [vmem:[%s1850_s5 + $0x40] sm:$0xff] }
  0xf4   : > { %v394_v11 = vmax.f32 %v390_v8, 0.0 }
  0xf5   : > { %v395_v12 = vmax.f32 %v392_v10, 0.0 }
  0xf6   : > { %485 = vrot.lane.b32.xlu0 %v394_v11, %s1596_s26 }
  0xf7   : > { %487 = vrot.lane.b32.xlu1 %v395_v12, %s1596_s26  ;;  %407 = vmatprep.subr.mxu1 %v395_v12  ;;  %s1801_s26 = scalar_lea.hbm %s1853_s8, %s1464_s23 }
  0xf8   : > { %408 = vmatpush1.msra.mxu1 %v394_v11 }
  0xf9   : > { %1431 = vmatmul.mubr.msk.f32.vlgmr.msra.gmra.mrb[2].mxu1 %vm403_vm2, %v396_v18 }
  0xfa   : > { %517 = vrot.lane.b32.xlu0 %v395_v12, %s1597_s10  ;;  %623 = vmatprep.mubr.f32.mxu1 %v1594_v0 }
  0xfb   : > { %515 = vrot.lane.b32.xlu1 %v394_v11, %s1597_s10  ;;  %s1803_s10 = scalar_lea.sflag [#allocation4], %s296_s18 }
 0x168   : > { %v486_v26 = vpop.permute.xlu0 %485 }
 0x169   : > { %v493_v27 = vsel %vm489_vm3, 0.0, %v486_v26  ;;  %v488_v28 = vpop.permute.xlu1 %487 }
 0x16a   : > { %v513_v29 = vmul.f32 %v508_v22, %v493_v27  ;;  %v490_v30 = vsel %vm489_vm3, %v486_v26, %v488_v28 }
 0x16b   : > { %v514_v32 = vmul.f32 %v512_v25, %v490_v30 }
 0x16c   : > { %547 = vrot.lane.b32.xlu1 %v513_v29, %s1598_s19  ;;  %v518_v33 = vpop.permute.xlu0 %517 }
 0x16d   : > { %v523_v35 = vsel %vm519_vm4, %v518_v33, 0.0  ;;  %549 = vrot.lane.b32.xlu0 %v514_v32, %s1598_s19  ;;  %819 = vmatprep.subr.mxu0 %v514_v32  ;;  %v516_v38 = vpop.permute.xlu1 %515 }
 0x16e   : > { %v543_v36 = vmul.f32 %v541_v31, %v523_v35  ;;  %820 = vmatpush1.msra.mxu0 %v513_v29  ;;  %v520_v40 = vsel %vm519_vm4, %v516_v38, %v518_v33 }
 0x16f   : > { %1444 = vmatmul.mubr.msk.f32.vlgmr.msra.gmra.mrb[0].mxu0 %vm403_vm2, %v1443_v34  ;;  %901 = vmatprep.subr.mxu0 %v395_v12  ;;  %v542_v42 = vmul.f32 %v537_v39, %v520_v40 }
 0x170   : > { %1062 = vrot.lane.b32.xlu1 %v513_v29, %s1599_s22  ;;  %902 = vmatpush1.msra.mxu0 %v394_v11 }
 0x171   : > { %1064 = vrot.lane.b32.xlu0 %v514_v32, %s1599_s22  ;;  %983 = vmatprep.subr.mxu0 %v543_v36 }
 0x172   : > { %965 = vmatprep.mubr.f32.mxu0 %v1594_v0 }
 0x174   : > { %634 = vrot.lane.b32.xlu1 %v394_v11, %s1598_s19 }
 0x175   : > { %636 = vrot.lane.b32.xlu0 %v395_v12, %s1598_s19 }
 0x177   : > { %1446 = vmatmul.mubr.msk.f32.vlgmr.msra.gmra.mrb[0].mxu0 %vm403_vm2, %v1445_v41 }
 0x178   : > { %984 = vmatpush1.msra.mxu0 %v542_v42  ;;  %1153 = vrot.lane.b32.xlu1 %v394_v11, %s1599_s22 }
 0x179   : > { %1155 = vrot.lane.b32.xlu0 %v395_v12, %s1599_s22  ;;  %1047 = vmatprep.mubr.f32.mxu0 %v1594_v0 }
 0x17c   : > { %726 = vrot.lane.b32.xlu1 %v542_v42, %s1598_s19 }
 0x17d   : > { %728 = vrot.lane.b32.xlu0 %v543_v36, %s1598_s19 }
 0x17f   : > { %1448 = vmatmul.mubr.msk.f32.vlgmr.msra.gmra.mrb[0].mxu0 %vm403_vm2, %v1447_v43 }
 0x180   : > { %1243 = vrot.lane.b32.xlu1 %v542_v42, %s1599_s22  ;;  %1138 = vmatprep.mubr.f32.mxu0 %v1594_v0 }
 0x181   : > { %1245 = vrot.lane.b32.xlu0 %v543_v36, %s1599_s22  ;;  %s1359_s22 = sshll.u32 %s298_s21, 4  ;;  %s1796_s22 = int_to_ptr.vmem [resolvable:$true] %s1359_s22 }
 0x182   : > { %s1530_s12 = scalar_lea.vmem %s1796_s22, 512  ;;  %p1537_p0 = scmp.lt.s32.totalorder %s1796_s22, %s1535_s13 }
 0x183   : > { %p1531_p11 = scmp.ne.s32.totalorder %s1796_s22, %s1530_s12  ;;  %p1538_p1 = scmp.lt.s32.totalorder %s1536_s17, %s1530_s12 }
 0x184   : > { %400 = vperm.xlu1 %1528, %v397_v45  }
 0x185   : > { %1336 = vperm.xlu0 %1527, %v1333_v44   ;;  %p1532_p12 = pnand %p1531_p11, %p1685_p5  ;;  %p1539_p2 = por %p1538_p1, %p1537_p0 }
 0x187   : > { %p1533_p13 = pneg %p1532_p12 }
 0x189   : > { %p1540_p3 = pnand %p1539_p2, %p1533_p13 }
 0x1cc   : > { %v473_v8 = vpop.f32.mrb[2].mxu1 }
 0x1cd   : > { %v475_v10 = vpop.f32.mrb[3].mxu1 }
 0x1de   : > { %v548_v46 = vpop.permute.xlu1 %547 }
 0x1df   : > { %v550_v47 = vpop.permute.xlu0 %549 }
 0x1e0   : > { %v552_v49 = vsel %vm551_vm5, %v548_v46, %v550_v47 }
 0x1e1   : > { %559 = vmatprep.subr.mxu1 %v552_v49 }
 0x1e2   : > { %v1063_v51 = vpop.permute.xlu1 %1062  ;;  %1433 = vmatpush1.msk.msra.mxu1 %vm1747_vm6, %v548_v46 }
 0x1e3   : > { %v1065_v52 = vpop.permute.xlu0 %1064  ;;  %1434 = vmatmul.mubr.msk.f32.vlgmr.msra.gmra.mrb[4].mxu1 %vm403_vm2, %v544_v50 }
 0x1e4   : > { %v1067_v54 = vsel %vm1066_vm7, %v1063_v51, %v1065_v52  ;;  %1450 = vmatprep.subr.msk.mxu0 %vm1066_vm7, %v1065_v52  ;;  %709 = vmatprep.mubr.f32.mxu1 %v1594_v0 }
 0x1e5   : > { %1075 = vmatpush1.msra.mxu0 %v1067_v54 }
 0x1e6   : > { %v635_v55 = vpop.permute.xlu1 %634  ;;  %1451 = vmatmul.mubr.msk.f32.vlgmr.msra.gmra.mrb[0].mxu0 %vm403_vm2, %v1449_v53 }
 0x1e7   : > { %v637_v56 = vpop.permute.xlu0 %636  ;;  %1228 = vmatprep.mubr.f32.mxu0 %v1594_v0 }
 0x1e8   : > { %v638_v57 = vsel %vm551_vm5, %v635_v55, %v637_v56 }
 0x1e9   : > { %645 = vmatprep.subr.mxu1 %v638_v57 }
 0x1ea   : > { %v1154_v59 = vpop.permute.xlu1 %1153  ;;  %1437 = vmatpush1.msk.msra.mxu1 %vm1747_vm6, %v635_v55 }
 0x1eb   : > { %v1156_v60 = vpop.permute.xlu0 %1155  ;;  %1438 = vmatmul.mubr.msk.f32.vlgmr.msra.gmra.mrb[4].mxu1 %vm403_vm2, %v1435_v58 }
 0x1ec   : > { %v1157_v62 = vsel %vm1066_vm7, %v1154_v59, %v1156_v60  ;;  %1453 = vmatprep.subr.msk.mxu0 %vm1066_vm7, %v1156_v60  ;;  %801 = vmatprep.mubr.f32.mxu1 %v1594_v0 }
 0x1ed   : > { %1165 = vmatpush1.msra.mxu0 %v1157_v62 }
 0x1ee   : > { %v727_v63 = vpop.permute.xlu1 %726  ;;  %1454 = vmatmul.mubr.msk.f32.vlgmr.msra.gmra.mrb[0].mxu0 %vm403_vm2, %v1452_v61 }
 0x1ef   : > { %v729_v1 = vpop.permute.xlu0 %728  ;;  %1318 = vmatprep.mubr.f32.mxu0 %v1594_v0 }
 0x1f0   : > { %v730_v2 = vsel %vm551_vm5, %v727_v63, %v729_v1 }
 0x1f1   : > { %737 = vmatprep.subr.mxu1 %v730_v2 }
 0x1f2   : > { %v1244_v4 = vpop.permute.xlu1 %1243  ;;  %1441 = vmatpush1.msk.msra.mxu1 %vm1747_vm6, %v727_v63 }
 0x1f3   : > { %v1246_v5 = vpop.permute.xlu0 %1245  ;;  %1442 = vmatmul.mubr.msk.f32.vlgmr.msra.gmra.mrb[4].mxu1 %vm403_vm2, %v1439_v3 }
 0x1f4   : > { %v1247_v0 = vsel %vm1066_vm7, %v1244_v4, %v1246_v5  ;;  %1456 = vmatprep.subr.msk.mxu0 %vm1066_vm7, %v1246_v5 }
 0x1f5   : > { %1255 = vmatpush1.msra.mxu0 %v1247_v0 }
 0x1f6   : > { %1457 = vmatmul.mubr.msk.f32.vlgmr.msra.gmra.mrb[0].mxu0 %vm403_vm2, %v1455_v6 }
 0x203   : > { %v401_v7 = vpop.permute.xlu1 %400 }
 0x204   : > { %v474_v9 = vadd.f32 %v473_v8, %v401_v7  ;;  %v476_v11 = vadd.f32 %v475_v10, %v401_v7  ;;  %v1337_v19 = vpop.permute.xlu0 %1336 }
 0x206   : > { %v478_v12 = vmax.f32 %v474_v9, 0.0  ;;  %v479_v13 = vmax.f32 %v476_v11, 0.0 }
 0x208   : > { %480 = vst [vmem:[%s298_s21] sm:$0xff] %v478_v12  ;;  %481 = vst [vmem:[%s298_s21 + $0x8] sm:$0xff] %v479_v13 }
 0x2c6   : > { %v803_v14 = vpop.f32.mrb[4].mxu1 }
 0x2c7   : > { %v805_v15 = vpop.f32.mrb[5].mxu1 }
 0x2c9   : > { %v1320_v16 = vpop.f32.mrb[0].mxu0 }
 0x2ca   : > { %v1465_v17 = vadd.f32 %v1320_v16, %v803_v14  ;;  %v1322_v18 = vpop.f32.mrb[1].mxu0 }
 0x2cb   : > { %v1466_v20 = vadd.f32 %v1322_v18, %v805_v15 }
 0x2cc   : > { %v1339_v21 = vadd.f32 %v1465_v17, %v1337_v19 }
 0x2cd   : > { %v1340_v22 = vadd.f32 %v1466_v20, %v1337_v19 }
 0x2ce   : > { %v1341_v23 = vmax.f32 %v1339_v21, 0.0 }
 0x2cf   : > { %v1342_v24 = vmax.f32 %v1340_v22, 0.0 }
 0x2d0   : > { %1343 = vst [vmem:[%s298_s21 + $0x10] sm:$0xff] %v1341_v23 }
 0x2d1   : > { %1344 = vst [vmem:[%s298_s21 + $0x18] sm:$0xff] %v1342_v24 }
 0x2d2   : > { %1543 = shalt.err (!%p1540_p3)
}
 0x2d3   : > { %s1544_s18 = scalar_lea.hbm %s1801_s26, 512  ;;  %s1548_s23 = scalar_lea.hbm %s1853_s8, 1024 }
 0x2d4   : > { %p1545_p4 = scmp.ne.s32.totalorder %s1801_s26, %s1544_s18  ;;  %p1549_p9 = scmp.lt.u32.totalorder %s1801_s26, %s1853_s8 }
 0x2d5   : > { %p1550_p10 = scmp.lt.u32.totalorder %s1548_s23, %s1544_s18  ;;  %p1552_p12 = scmp.lt.u32.totalorder %s1544_s18, %s1801_s26 }
 0x2d6   : > { %p1546_p7 = pnand %p1545_p4, %p1685_p5 }
 0x2d7   : > { %p1551_p11 = por %p1550_p10, %p1549_p9 }
 0x2d8   : > { %p1547_p8 = pneg %p1546_p7 }
 0x2d9   : > { %p1553_p13 = por %p1552_p12, %p1551_p11 }
 0x2db   : > { %p1554_p0 = pnand %p1553_p13, %p1547_p8 }
 0x2dd   : > { %1557 = shalt.err (!%p1554_p0)
}
 0x2de   : > { %s1601_s12 = smov 256  }
 0x2df   : > { %1481 = dma.vmem_to_hbm [thread:$0]  (%p1685_p5), %s1796_s22, 512, %s1801_s26, %s1803_s10, %s1601_s12, %s1601_s12, %s1598_s19  }
 0x2e0 PF: > { %p1487_p1 = scmp.ge.s32.totalorder %s1592_s30, 2  ;;  %s1374_s9 = sand.u32 1, %s1580_s27  }
 0x2e1   : > { %s1375_s13 = scalar_lea.sflag [#allocation4], %s1374_s9 }
 0x2e2   : > { %p1484_p2 = pnand %p1487_p1, %p1689_p6 }
 0x2e4   : > { %1575 = dma.done.wait (!%p1484_p2), %s1375_s13, 512  }
 0x2e5   : > { %1577 = vsyncadd (!%p1484_p2), %s1375_s13, 4294966784  ;;  %p18_p3 = scmp.ge.s32.totalorder %s1672_s11, 4   ;;  %s1858_s27 = smov %s1584_s28 }
 0x2e6   : > { %s1859_s28 = smov %s1588_s29  ;;  %s1860_s29 = smov %s1683_s14 }
 0x2e7   : > { %s1861_s30 = smov %s1672_s11  ;;  %20 = sbr.rel (!%p18_p3) target bundleno = 3 (0x3), region = 95 }
 0x2ee   :  { %1380 = vsyncpa [#allocation4], 1 }
 0x2ef   :  { %1382 = vsyncpa [#allocation4 + $0x1], 1 }

</bundles_post_ra>
